<compile_context>
chip_gen: v7x
topology: tpu7x:2x2x1
jax: 0.10.0
libtpu: 0.0.40
codegen_flags: <defaults>
</compile_context>

<pallas_src>
import functools

import numpy as np
import jax
import jax.numpy as jnp
from jax.experimental import pallas as pl
from jax.experimental.pallas import tpu as pltpu

# --- model config (small, consistent with the module) -----------------------
PARAMS_DIM = 4
NUM_KNOTS = 8
INPUT_DIM = PARAMS_DIM + NUM_KNOTS   # x = [params_vec | v_knots]
BATCH = 2
OUT_PAD = 128                        # lane-dense output width (real outputs in first NUM_KNOTS lanes)
XCOLS = 16                           # x padded to 16 columns (head matmul K)
SUB = 16                             # sublane tile (bf16-safe) used for batch rounding

# Row offsets of each weight matrix inside the packed bf16 weight slab.
# All offsets / row counts are multiples of 16 -> static slices are free views.
R_WH, N_WH = 0, 16          # fused head: [16, 256]
R_WC2, N_WC2 = 16, 128      # conv2 banded dense (lane-padded): [128, 128]
R_WK1, N_WK1 = 144, 128     # fc_k1^T (row-padded):             [128, 128]
R_WF1, N_WF1 = 272, 256     # fc_f1^T:                          [256, 256]
R_WF2, N_WF2 = 528, 256     # fc_f2^T:                          [256, 128]
R_WOUT, N_WOUT = 784, 128   # fc_out^T (lane-padded):           [128, 128]
W_ROWS = 912
W_COLS = 256


# --- Pallas kernel: the entire forward pass ---------------------------------
def convknot_kernel(x_ref, w_ref, b_ref, out_ref, *, act_dtype):
    def mm(a, w):
        # bf16 MXU inputs (single pass), f32 accumulation.
        return jnp.dot(a.astype(jnp.bfloat16), w, preferred_element_type=jnp.float32)

    zero = jnp.zeros((), act_dtype)

    def act(pre_f32, bias_f32):
        # Bias add + ReLU in act_dtype (f32 on v5e, bf16 on v6e/v7x).
        return jnp.maximum(pre_f32.astype(act_dtype) + bias_f32.astype(act_dtype), zero)

    x = x_ref[...]                                            # [TM, 16] f32

    # Static, tile-aligned views into the packed slabs (no data movement).
    wh = w_ref[R_WH:R_WH + N_WH, :]                           # [16, 256]
    wc2 = w_ref[R_WC2:R_WC2 + N_WC2, :128]                    # [128, 128]
    wk1 = w_ref[R_WK1:R_WK1 + N_WK1, :128]                    # [128, 128]
    wf1 = w_ref[R_WF1:R_WF1 + N_WF1, :]                       # [256, 256]
    wf2 = w_ref[R_WF2:R_WF2 + N_WF2, :128]                    # [256, 128]
    wout = w_ref[R_WOUT:R_WOUT + N_WOUT, :128]                # [128, 128]

    # Fused head: block-diag(fc_p1^T, conv1_dense) -> one [TM,16]@[16,256] matmul.
    h_head = act(mm(x, wh), b_ref[0:1, :])                    # [TM, 256]
    h_p = h_head[:, :128]                                     # fc_p1 branch
    h1 = h_head[:, 128:]                                      # conv1 branch (16*T), channel-major

    # conv2 (16->8, k=3, pad=1) as a banded dense matmul, then fc_k1 (lane-dense).
    h2 = act(mm(h1, wc2), b_ref[1:2, :128])                   # [TM, 128] (lanes 64:128 are zero)
    h_k = act(mm(h2, wk1), b_ref[2:3, :128])                  # [TM, 128]

    # cat([h_p, h_k], dim=1) at the 128-lane boundary, single K=256 matmul.
    h = jnp.concatenate([h_p, h_k], axis=1)                   # [TM, 256]
    h = act(mm(h, wf1), b_ref[3:4, :])                        # [TM, 256]
    h = act(mm(h, wf2), b_ref[4:5, :128])                     # [TM, 128]

    out = mm(h, wout) + b_ref[5:6, :128]                      # [TM, 128] f32
    out_ref[...] = out.astype(out_ref.dtype)                  # bf16 lane-dense store


# --- parameter setup (deterministic, torch-like shapes) ---------------------
def init_torch_like_params(key):
    def uniform(k, shape, bound):
        return np.asarray(jax.random.uniform(k, shape, jnp.float32, -bound, bound))

    keys = jax.random.split(key, 14)
    p = {}
    b = 1.0 / np.sqrt(PARAMS_DIM)
    p["fc_p1_w"] = uniform(keys[0], (128, PARAMS_DIM), b)
    p["fc_p1_b"] = uniform(keys[1], (128,), b)
    b = 1.0 / np.sqrt(1 * 3)
    p["conv1_w"] = uniform(keys[2], (16, 1, 3), b)
    p["conv1_b"] = uniform(keys[3], (16,), b)
    b = 1.0 / np.sqrt(16 * 3)
    p["conv2_w"] = uniform(keys[4], (8, 16, 3), b)
    p["conv2_b"] = uniform(keys[5], (8,), b)
    b = 1.0 / np.sqrt(8 * NUM_KNOTS)
    p["fc_k1_w"] = uniform(keys[6], (128, 8 * NUM_KNOTS), b)
    p["fc_k1_b"] = uniform(keys[7], (128,), b)
    b = 1.0 / np.sqrt(256)
    p["fc_f1_w"] = uniform(keys[8], (256, 256), b)
    p["fc_f1_b"] = uniform(keys[9], (256,), b)
    b = 1.0 / np.sqrt(256)
    p["fc_f2_w"] = uniform(keys[10], (128, 256), b)
    p["fc_f2_b"] = uniform(keys[11], (128,), b)
    b = 1.0 / np.sqrt(128)
    p["fc_out_w"] = uniform(keys[12], (NUM_KNOTS, 128), b)
    p["fc_out_b"] = uniform(keys[13], (NUM_KNOTS,), b)
    return p


def conv1d_to_dense(w, T):
    """Conv1d weight [C_out, C_in, 3] (padding=1) -> dense [C_in*T, C_out*T]
    such that flat_out = flat_in @ dense with channel-major (c*T + t) flatten."""
    c_out, c_in, K = w.shape
    dense = np.zeros((c_in * T, c_out * T), np.float32)
    for co in range(c_out):
        for ci in range(c_in):
            for t in range(T):
                for k in range(K):
                    ti = t + k - 1
                    if 0 <= ti < T:
                        dense[ci * T + ti, co * T + t] = w[co, ci, k]
    return dense


def pack_kernel_params(p):
    """Pack all weights into one bf16 [912,256] slab and all biases into one
    f32 [8,256] slab (2 input arrays instead of 13)."""
    T = NUM_KNOTS

    wslab = np.zeros((W_ROWS, W_COLS), np.float32)
    # Fused head: rows = padded x columns (0:4 params, 4:12 knots, 12:16 zero pad).
    wslab[R_WH:R_WH + PARAMS_DIM, 0:128] = p["fc_p1_w"].T
    wslab[R_WH + PARAMS_DIM:R_WH + PARAMS_DIM + T, 128:256] = conv1d_to_dense(p["conv1_w"], T)
    # conv2 banded dense [128, 64] -> lanes 0:64 (lane-padded to 128).
    wslab[R_WC2:R_WC2 + 128, 0:8 * T] = conv1d_to_dense(p["conv2_w"], T)
    # fc_k1^T [64, 128] -> rows 0:64 (row-padded to 128; padded h2 lanes are zero).
    wslab[R_WK1:R_WK1 + 8 * T, 0:128] = p["fc_k1_w"].T
    # fc_f1^T [256, 256] (merged: rows 0:128 multiply h_p, rows 128:256 multiply h_k).
    wslab[R_WF1:R_WF1 + 256, 0:256] = p["fc_f1_w"].T
    # fc_f2^T [256, 128].
    wslab[R_WF2:R_WF2 + 256, 0:128] = p["fc_f2_w"].T
    # fc_out^T [128, 8] -> lanes 0:8 (lane-padded to 128).
    wslab[R_WOUT:R_WOUT + 128, 0:T] = p["fc_out_w"].T

    bslab = np.zeros((8, W_COLS), np.float32)
    bslab[0, 0:128] = p["fc_p1_b"]
    bslab[0, 128:256] = np.repeat(p["conv1_b"], T)   # channel-major, matches c*T+t
    bslab[1, 0:8 * T] = np.repeat(p["conv2_b"], T)
    bslab[2, 0:128] = p["fc_k1_b"]
    bslab[3, 0:256] = p["fc_f1_b"]
    bslab[4, 0:128] = p["fc_f2_b"]
    bslab[5, 0:T] = p["fc_out_b"]

    return jnp.asarray(wslab, jnp.bfloat16), jnp.asarray(bslab, jnp.float32)


# --- wrapper -----------------------------------------------------------------
def _round_up(n, m):
    return (n + m - 1) // m * m


def _pick_act_dtype():
    """bf16 elementwise (bias add / ReLU) on v6e / v7x (bf16 VPU); f32 elsewhere."""
    try:
        kind = jax.devices()[0].device_kind.lower()
    except Exception:
        return jnp.float32
    if ("v6" in kind) or ("v7" in kind) or ("trillium" in kind):
        return jnp.bfloat16
    return jnp.float32


@functools.partial(jax.jit, static_argnames=("tm", "act_dtype"))
def convknot_forward(x, wslab, bslab, *, tm=512, act_dtype=jnp.float32):
    B = x.shape[0]
    tm = _round_up(tm, SUB)
    b_pad = _round_up(B, SUB)
    if b_pad > SUB:
        # Guarantee >= 2 grid steps once there is more than one 16-row tile of
        # work, so the batch axis can shard across v7x's two TensorCores.
        tm = min(tm, _round_up((b_pad + 1) // 2, SUB))
    else:
        tm = b_pad
    bp = _round_up(B, tm)
    grid = (bp // tm,)

    # Pad batch rows to bp and feature columns to XCOLS (zeros).
    x = jnp.pad(x, ((0, bp - B), (0, XCOLS - x.shape[1])))

    in_specs = [
        pl.BlockSpec((tm, XCOLS), lambda i: (i, 0)),
        # Weight/bias slabs: same block every grid step -> DMA'd once, VMEM-resident.
        pl.BlockSpec(wslab.shape, lambda i: (0, 0)),
        pl.BlockSpec(bslab.shape, lambda i: (0, 0)),
    ]

    out = pl.pallas_call(
        functools.partial(convknot_kernel, act_dtype=act_dtype),
        out_shape=jax.ShapeDtypeStruct((bp, OUT_PAD), jnp.bfloat16),
        grid=grid,
        in_specs=in_specs,
        out_specs=pl.BlockSpec((tm, OUT_PAD), lambda i: (i, 0)),
        compiler_params=pltpu.CompilerParams(
            dimension_semantics=("parallel",)),   # batch axis across v7x's 2 TCs
    )(x, wslab, bslab)
    return out[:B, :NUM_KNOTS].astype(jnp.float32)


# --- pure-numpy reference (mirrors the PyTorch forward) ----------------------
def reference_forward(x, p):
    T = NUM_KNOTS
    relu = lambda a: np.maximum(a, 0.0)
    B = x.shape[0]
    pv = x[:, :PARAMS_DIM]
    v = x[:, -T:]
    h_p = relu(pv @ p["fc_p1_w"].T + p["fc_p1_b"])
    vpad = np.pad(v, ((0, 0), (1, 1)))
    h1 = np.zeros((B, 16, T), np.float32)
    for c in range(16):
        for t in range(T):
            h1[:, c, t] = (sum(p["conv1_w"][c, 0, k] * vpad[:, t + k] for k in range(3))
                           + p["conv1_b"][c])
    h1 = relu(h1)
    h1pad = np.pad(h1, ((0, 0), (0, 0), (1, 1)))
    h2 = np.zeros((B, 8, T), np.float32)
    for co in range(8):
        for t in range(T):
            acc = np.full((B,), p["conv2_b"][co], np.float32)
            for ci in range(16):
                for k in range(3):
                    acc = acc + p["conv2_w"][co, ci, k] * h1pad[:, ci, t + k]
            h2[:, co, t] = acc
    h2 = relu(h2)
    h_k = relu(h2.reshape(B, -1) @ p["fc_k1_w"].T + p["fc_k1_b"])
    h = np.concatenate([h_p, h_k], axis=1)
    h = relu(h @ p["fc_f1_w"].T + p["fc_f1_b"])
    h = relu(h @ p["fc_f2_w"].T + p["fc_f2_b"])
    return h @ p["fc_out_w"].T + p["fc_out_b"]


if __name__ == "__main__":
    key = jax.random.PRNGKey(0)
    kx, kp = jax.random.split(key)
    x = jax.random.normal(kx, (BATCH, INPUT_DIM), jnp.float32)

    params = init_torch_like_params(kp)
    wslab, bslab = pack_kernel_params(params)

    out = convknot_forward(x, wslab, bslab, act_dtype=_pick_act_dtype())
    out = jax.block_until_ready(out)

    ref = reference_forward(np.asarray(x), params)
    # Tolerance covers bf16 MXU inputs (+ bf16 elementwise on v6e/v7x) and the
    # bf16 output store vs. the f32 numpy reference.
    np.testing.assert_allclose(np.asarray(out), ref, rtol=2.5e-2, atol=5e-3)
    print("KERNEL_OK")
</pallas_src>

<mosaic_0001>
module attributes {stable_mosaic.version = 11 : i64} {
  func.func @convknot_kernel(%arg0: i32, %arg1: memref<16x16xf32, #tpu.memory_space<vmem>>, %arg2: memref<912x256xbf16, #tpu.memory_space<vmem>>, %arg3: memref<8x256xf32, #tpu.memory_space<vmem>>, %arg4: memref<16x128xbf16, #tpu.memory_space<vmem>>) attributes {dimension_semantics = [#tpu.dimension_semantics<parallel>], iteration_bounds = array<i64: 1>, scalar_prefetch = 0 : i64, scratch_operands = 0 : i64, tpu.core_type = #tpu.core_type<tc>, window_params = [{transform_indices = @transform_0, window_bounds = array<i64: 16, 16>}, {pipeline_mode = #tpu.pipeline_mode<synchronous>, transform_indices = @transform_1, window_bounds = array<i64: 912, 256>}, {pipeline_mode = #tpu.pipeline_mode<synchronous>, transform_indices = @transform_2, window_bounds = array<i64: 8, 256>}, {transform_indices = @transform_3, window_bounds = array<i64: 16, 128>}]} {
    %c0 = arith.constant 0 : index
    %c0_0 = arith.constant 0 : index
    %0 = vector.load %arg1[%c0, %c0_0] : memref<16x16xf32, #tpu.memory_space<vmem>>, vector<16x16xf32>
    %c0_1 = arith.constant 0 : index
    %c0_2 = arith.constant 0 : index
    %1 = vector.load %arg2[%c0_1, %c0_2] : memref<912x256xbf16, #tpu.memory_space<vmem>>, vector<16x256xbf16>
    %c16 = arith.constant 16 : index
    %c0_3 = arith.constant 0 : index
    %2 = vector.load %arg2[%c16, %c0_3] : memref<912x256xbf16, #tpu.memory_space<vmem>>, vector<128x128xbf16>
    %c144 = arith.constant 144 : index
    %c0_4 = arith.constant 0 : index
    %3 = vector.load %arg2[%c144, %c0_4] : memref<912x256xbf16, #tpu.memory_space<vmem>>, vector<128x128xbf16>
    %c272 = arith.constant 272 : index
    %c0_5 = arith.constant 0 : index
    %4 = vector.load %arg2[%c272, %c0_5] : memref<912x256xbf16, #tpu.memory_space<vmem>>, vector<256x256xbf16>
    %c528 = arith.constant 528 : index
    %c0_6 = arith.constant 0 : index
    %5 = vector.load %arg2[%c528, %c0_6] : memref<912x256xbf16, #tpu.memory_space<vmem>>, vector<256x128xbf16>
    %c784 = arith.constant 784 : index
    %c0_7 = arith.constant 0 : index
    %6 = vector.load %arg2[%c784, %c0_7] : memref<912x256xbf16, #tpu.memory_space<vmem>>, vector<128x128xbf16>
    %7 = arith.truncf %0 : vector<16x16xf32> to vector<16x16xbf16>
    %cst = arith.constant dense<0.000000e+00> : vector<16x256xf32>
    %8 = tpu.matmul %7, %1, %cst {dimension_numbers = #tpu.dot_dimension_numbers<[1], [0], [0], [1], [0, 0, 1, 1], [], []>} : vector<16x16xbf16>, vector<16x256xbf16>, vector<16x256xf32> -> vector<16x256xf32>
    %c0_8 = arith.constant 0 : index
    %c0_9 = arith.constant 0 : index
    %9 = vector.load %arg3[%c0_8, %c0_9] : memref<8x256xf32, #tpu.memory_space<vmem>>, vector<1x256xf32>
    %10 = vector.broadcast %9 : vector<1x256xf32> to vector<16x256xf32>
    %11 = arith.addf %8, %10 : vector<16x256xf32>
    %cst_10 = arith.constant 0.000000e+00 : f32
    %12 = vector.broadcast %cst_10 : f32 to vector<16x256xf32>
    %13 = arith.maximumf %11, %12 : vector<16x256xf32>
    %14 = vector.extract_strided_slice %13 {offsets = [0, 0], sizes = [16, 128], strides = [1, 1]} : vector<16x256xf32> to vector<16x128xf32>
    %15 = vector.extract_strided_slice %13 {offsets = [0, 128], sizes = [16, 128], strides = [1, 1]} : vector<16x256xf32> to vector<16x128xf32>
    %16 = arith.truncf %15 : vector<16x128xf32> to vector<16x128xbf16>
    %cst_11 = arith.constant dense<0.000000e+00> : vector<16x128xf32>
    %17 = tpu.matmul %16, %2, %cst_11 {dimension_numbers = #tpu.dot_dimension_numbers<[1], [0], [0], [1], [0, 0, 1, 1], [], []>} : vector<16x128xbf16>, vector<128x128xbf16>, vector<16x128xf32> -> vector<16x128xf32>
    %c1 = arith.constant 1 : index
    %c0_12 = arith.constant 0 : index
    %18 = vector.load %arg3[%c1, %c0_12] : memref<8x256xf32, #tpu.memory_space<vmem>>, vector<1x128xf32>
    %19 = vector.broadcast %18 : vector<1x128xf32> to vector<16x128xf32>
    %20 = arith.addf %17, %19 : vector<16x128xf32>
    %cst_13 = arith.constant 0.000000e+00 : f32
    %21 = vector.broadcast %cst_13 : f32 to vector<16x128xf32>
    %22 = arith.maximumf %20, %21 : vector<16x128xf32>
    %23 = arith.truncf %22 : vector<16x128xf32> to vector<16x128xbf16>
    %cst_14 = arith.constant dense<0.000000e+00> : vector<16x128xf32>
    %24 = tpu.matmul %23, %3, %cst_14 {dimension_numbers = #tpu.dot_dimension_numbers<[1], [0], [0], [1], [0, 0, 1, 1], [], []>} : vector<16x128xbf16>, vector<128x128xbf16>, vector<16x128xf32> -> vector<16x128xf32>
    %c2 = arith.constant 2 : index
    %c0_15 = arith.constant 0 : index
    %25 = vector.load %arg3[%c2, %c0_15] : memref<8x256xf32, #tpu.memory_space<vmem>>, vector<1x128xf32>
    %26 = vector.broadcast %25 : vector<1x128xf32> to vector<16x128xf32>
    %27 = arith.addf %24, %26 : vector<16x128xf32>
    %cst_16 = arith.constant 0.000000e+00 : f32
    %28 = vector.broadcast %cst_16 : f32 to vector<16x128xf32>
    %29 = arith.maximumf %27, %28 : vector<16x128xf32>
    %30 = tpu.concatenate %14, %29 in 1 : vector<16x128xf32>, vector<16x128xf32> -> vector<16x256xf32>
    %31 = arith.truncf %30 : vector<16x256xf32> to vector<16x256xbf16>
    %cst_17 = arith.constant dense<0.000000e+00> : vector<16x256xf32>
    %32 = tpu.matmul %31, %4, %cst_17 {dimension_numbers = #tpu.dot_dimension_numbers<[1], [0], [0], [1], [0, 0, 1, 1], [], []>} : vector<16x256xbf16>, vector<256x256xbf16>, vector<16x256xf32> -> vector<16x256xf32>
    %c3 = arith.constant 3 : index
    %c0_18 = arith.constant 0 : index
    %33 = vector.load %arg3[%c3, %c0_18] : memref<8x256xf32, #tpu.memory_space<vmem>>, vector<1x256xf32>
    %34 = vector.broadcast %33 : vector<1x256xf32> to vector<16x256xf32>
    %35 = arith.addf %32, %34 : vector<16x256xf32>
    %cst_19 = arith.constant 0.000000e+00 : f32
    %36 = vector.broadcast %cst_19 : f32 to vector<16x256xf32>
    %37 = arith.maximumf %35, %36 : vector<16x256xf32>
    %38 = arith.truncf %37 : vector<16x256xf32> to vector<16x256xbf16>
    %cst_20 = arith.constant dense<0.000000e+00> : vector<16x128xf32>
    %39 = tpu.matmul %38, %5, %cst_20 {dimension_numbers = #tpu.dot_dimension_numbers<[1], [0], [0], [1], [0, 0, 1, 1], [], []>} : vector<16x256xbf16>, vector<256x128xbf16>, vector<16x128xf32> -> vector<16x128xf32>
    %c4 = arith.constant 4 : index
    %c0_21 = arith.constant 0 : index
    %40 = vector.load %arg3[%c4, %c0_21] : memref<8x256xf32, #tpu.memory_space<vmem>>, vector<1x128xf32>
    %41 = vector.broadcast %40 : vector<1x128xf32> to vector<16x128xf32>
    %42 = arith.addf %39, %41 : vector<16x128xf32>
    %cst_22 = arith.constant 0.000000e+00 : f32
    %43 = vector.broadcast %cst_22 : f32 to vector<16x128xf32>
    %44 = arith.maximumf %42, %43 : vector<16x128xf32>
    %45 = arith.truncf %44 : vector<16x128xf32> to vector<16x128xbf16>
    %cst_23 = arith.constant dense<0.000000e+00> : vector<16x128xf32>
    %46 = tpu.matmul %45, %6, %cst_23 {dimension_numbers = #tpu.dot_dimension_numbers<[1], [0], [0], [1], [0, 0, 1, 1], [], []>} : vector<16x128xbf16>, vector<128x128xbf16>, vector<16x128xf32> -> vector<16x128xf32>
    %c5 = arith.constant 5 : index
    %c0_24 = arith.constant 0 : index
    %47 = vector.load %arg3[%c5, %c0_24] : memref<8x256xf32, #tpu.memory_space<vmem>>, vector<1x128xf32>
    %48 = vector.broadcast %47 : vector<1x128xf32> to vector<16x128xf32>
    %49 = arith.addf %46, %48 : vector<16x128xf32>
    %50 = arith.truncf %49 : vector<16x128xf32> to vector<16x128xbf16>
    %c0_25 = arith.constant 0 : index
    %c0_26 = arith.constant 0 : index
    %51 = vector.load %arg4[%c0_25, %c0_26] : memref<16x128xbf16, #tpu.memory_space<vmem>>, vector<16x128xbf16>
    tpu.vector_store %arg4[%c0_25, %c0_26], %50 {strides = array<i32>} : memref<16x128xbf16, #tpu.memory_space<vmem>>, vector<16x128xbf16>,
    return
  }
  func.func @transform_0(%arg0: i32) -> (i32, i32) {
    %c0_i32 = arith.constant 0 : i32
    %c0_i32_0 = arith.constant 0 : i32
    return %arg0, %c0_i32 : i32, i32
  }
  func.func @transform_1(%arg0: i32) -> (i32, i32) {
    %c0_i32 = arith.constant 0 : i32
    %c0_i32_0 = arith.constant 0 : i32
    %c0_i32_1 = arith.constant 0 : i32
    return %c0_i32, %c0_i32_0 : i32, i32
  }
  func.func @transform_2(%arg0: i32) -> (i32, i32) {
    %c0_i32 = arith.constant 0 : i32
    %c0_i32_0 = arith.constant 0 : i32
    %c0_i32_1 = arith.constant 0 : i32
    return %c0_i32, %c0_i32_0 : i32, i32
  }
  func.func @transform_3(%arg0: i32) -> (i32, i32) {
    %c0_i32 = arith.constant 0 : i32
    %c0_i32_0 = arith.constant 0 : i32
    return %arg0, %c0_i32 : i32, i32
  }
}

</mosaic_0001>

<bundles_post_ra>
// kernel: convknot_forward.1
= control target key start
LH: loop header
LB: loop body
LE: loop exit
PB: predicated region body
PF: predicated region fallthrough
CT: control target
= control target key end

     0   :  { %8 = vsyncpa [#allocation3], 0  ;;  %s1190_s12 = smov [#allocation2]   ;;  %s1300_s0 = inlined_call_operand.vmem [shape: f32[16,16], index: 0, kind: input, shape index: {}]   ;;  %s1301_s1 = inlined_call_operand.hbm [shape: bf16[912,256], index: 1, kind: input, shape index: {}]   ;;  %s1302_s2 = inlined_call_operand.vmem [shape: f32[8,256], index: 2, kind: input, shape index: {}]   ;;  %s1303_s3 = inlined_call_operand.vmem [shape: bf16[16,128], index: 3, kind: output, shape index: {}]  }
   0x1   :  { %s16_s13 = sshll.u32 %s1190_s12, 4  ;;  %s1166_s16 = scalar_lea.hbm %s1301_s1, 14592  ;;  %s17_s13 = int_to_ptr.vmem [resolvable:$true] %s16_s13 }
   0x2   :  { %p1167_p0 = scmp.ne.s32.totalorder %s1301_s1, %s1166_s16  ;;  %p1170_p1 = scmp.lt.u32.totalorder %s1166_s16, %s1301_s1 }
   0x4   :  { %p1172_p2 = pnand %p1170_p1, %p1167_p0 }
   0x6   :  { %1175 = shalt.err (!%p1172_p2)
}
   0x7   :  { %s1176_s21 = scalar_lea.vmem %s17_s13, 14592  ;;  %p1181_p4 = scmp.lt.s32.totalorder %s17_s13, %s17_s13 }
   0x8   :  { %p1177_p3 = scmp.ne.s32.totalorder %s17_s13, %s1176_s21  ;;  %p1182_p5 = scmp.lt.s32.totalorder %s1176_s21, %s1176_s21 }
   0xa   :  { %p1183_p6 = por %p1182_p5, %p1181_p4 }
   0xc   :  { %p1184_p7 = pnand %p1183_p6, %p1177_p3 }
   0xe   :  { %1187 = shalt.err (!%p1184_p7)
}
   0xf   :  { %s1191_s22 = smov 128   ;;  %s1192_s23 = smov 8  }
  0x10   :  { %22 = dma.hbm_to_vmem [thread:$0]  %s1301_s1, 14592, %s17_s13, [#allocation3], %s1191_s22, %s1191_s22, %s1192_s23  }
  0x11   :  { %1188 = dma.done.wait [#allocation3], 14592  }
  0x12   :  { %1189 = vsyncadd [#allocation3], 4294952704  ;;  %v1193_v0 = vmov 0   ;;  %v1194_v1 = vmov 0.0   ;;  %v1075_v2 = vld [vmem:[#allocation2 + $0x4] ss:$8 sps:$4 sm:$0xff]   ;;  %v148_v21 = vlaneseq }
  0x13   :  { %204 = vmatprep.mubr.bf16.mxu0 %v1193_v0  ;;  %1009 = vmatprep.subr.bf16.mxu1 %v1194_v1  ;;  %v1077_v3 = vld [vmem:[#allocation2] ss:$8 sps:$4 sm:$0xff]   ;;  %v29_v4 = vld [vmem:[%s1300_s0] sm:$0xff]  ;;  %v30_v5 = vld [vmem:[%s1300_s0 + $0x8] sm:$0xff]  ;;  %vm168_vm0 = vcmask 130048   ;;  %vm1195_vm1 = vmmov 0  }
  0x14   :  { %172 = vmatprep.subr.bf16.mxu0 %v1075_v2  ;;  %v145_v6 = vpack.c.bf16 %v30_v5, %v29_v4  ;;  %v1078_v7 = vld [vmem:[#allocation2 + $0x10] ss:$8 sps:$4 sm:$0xff]   ;;  %v1079_v8 = vld [vmem:[#allocation2 + $0x20] ss:$8 sps:$4 sm:$0xff]   ;;  %1025 = vmatprep.mubr.msk.bf16.mxu1 %vm1195_vm1, %v1194_v1  ;;  %v1253_v22 = vshrl.u32 %v148_v21, 7 }
  0x15   :  { %173 = vmatpush1.bf16.msra.mxu0 %v1077_v3  ;;  %1010 = vmatpush3.bf16.msra.mxu1 %v1078_v7  ;;  %v1080_v9 = vld [vmem:[#allocation2 + $0x30] ss:$8 sps:$4 sm:$0xff]   ;;  %v1081_v10 = vld [vmem:[#allocation2 + $0x40] ss:$8 sps:$4 sm:$0xff]   ;;  %v1096_v45 = vld [vmem:[#allocation2 + $0x114] ss:$8 sps:$4 sm:$0xff]  }
  0x16   :  { %1029 = vmatprep.subr.bf16.mxu0 %v1194_v1  ;;  %1011 = vmatprep.subr.bf16.mxu1 %v1194_v1  ;;  %v1082_v11 = vld [vmem:[#allocation2 + $0x50] ss:$8 sps:$4 sm:$0xff]   ;;  %v1083_v12 = vld [vmem:[#allocation2 + $0x60] ss:$8 sps:$4 sm:$0xff]   ;;  %v150_v23 = vsub.s32 0, %v1253_v22  ;;  %v154_v25 = vsub.s32 1, %v1253_v22 }
  0x17   :  { %v1084_v13 = vld [vmem:[#allocation2 + $0x70] ss:$8 sps:$4 sm:$0xff]   ;;  %v1085_v14 = vld [vmem:[#allocation2 + $0x80] ss:$8 sps:$4 sm:$0xff]   ;;  %v1099_v46 = vld [vmem:[#allocation2 + $0x124] ss:$8 sps:$4 sm:$0xff]  }
  0x18   :  { %877 = vmatmul.mubr.msk.bf16.vlgmr.msra.gmra.mrb[0].mxu0 %vm168_vm0, %v145_v6  ;;  %v1086_v15 = vld [vmem:[#allocation2 + $0x90] ss:$8 sps:$4 sm:$0xff]   ;;  %v1087_v16 = vld [vmem:[#allocation2 + $0xa0] ss:$8 sps:$4 sm:$0xff]   ;;  %v1102_v48 = vld [vmem:[#allocation2 + $0x134] ss:$8 sps:$4 sm:$0xff]  }
  0x19   :  { %1012 = vmatpush3.bf16.msra.mxu1 %v1079_v8  ;;  %1045 = vmatprep.mubr.msk.bf16.mxu0 %vm1195_vm1, %v1194_v1  ;;  %v1088_v17 = vld [vmem:[#allocation2 + $0xb0] ss:$8 sps:$4 sm:$0xff]   ;;  %v1089_v18 = vld [vmem:[#allocation2 + $0xc0] ss:$8 sps:$4 sm:$0xff]   ;;  %v1105_v50 = vld [vmem:[#allocation2 + $0x144] ss:$8 sps:$4 sm:$0xff]  }
  0x1a   :  { %1013 = vmatprep.subr.bf16.mxu1 %v1194_v1  ;;  %1030 = vmatpush3.bf16.msra.mxu0 %v1086_v15  ;;  %v1090_v19 = vld [vmem:[#allocation2 + $0xd0] ss:$8 sps:$4 sm:$0xff]   ;;  %v1091_v20 = vld [vmem:[#allocation2 + $0xe0] ss:$8 sps:$4 sm:$0xff]   ;;  %v1108_v52 = vld [vmem:[#allocation2 + $0x154] ss:$8 sps:$4 sm:$0xff]  }
  0x1b   :  { %1031 = vmatprep.subr.bf16.mxu0 %v1194_v1  ;;  %v146_v24 = vld [vmem:[%s1302_s2] ss:$8 sm:$0x3]  ;;  %v1093_v43 = vld [vmem:[#allocation2 + $0x100] ss:$8 sps:$4 sm:$0xff]  }
  0x1c   :  { %v151_v26 = vrot.slane %v146_v24, %v150_v23  ;;  %v155_v27 = vrot.slane %v146_v24, %v154_v25  ;;  %v1092_v42 = vld [vmem:[#allocation2 + $0xf0] ss:$8 sps:$4 sm:$0xff]   ;;  %v1097_v47 = vld [vmem:[#allocation2 + $0x120] ss:$8 sps:$4 sm:$0xff]   ;;  %v1111_v54 = vld [vmem:[#allocation2 + $0x164] ss:$8 sps:$4 sm:$0xff]  }
  0x1d   :  { %1014 = vmatpush3.bf16.msra.mxu1 %v1080_v9  ;;  %v1094_v44 = vld [vmem:[#allocation2 + $0x110] ss:$8 sps:$4 sm:$0xff]   ;;  %v1103_v51 = vld [vmem:[#allocation2 + $0x140] ss:$8 sps:$4 sm:$0xff]   ;;  %v1114_v56 = vld [vmem:[#allocation2 + $0x174] ss:$8 sps:$4 sm:$0xff]  }
  0x1e   :  { %1015 = vmatprep.subr.bf16.mxu1 %v1194_v1  ;;  %1032 = vmatpush3.bf16.msra.mxu0 %v1087_v16  ;;  %v1100_v49 = vld [vmem:[#allocation2 + $0x130] ss:$8 sps:$4 sm:$0xff]   ;;  %v1109_v55 = vld [vmem:[#allocation2 + $0x160] ss:$8 sps:$4 sm:$0xff]   ;;  %v1117_v58 = vld [vmem:[#allocation2 + $0x184] ss:$8 sps:$4 sm:$0xff]  }
  0x1f   :  { %1033 = vmatprep.subr.bf16.mxu0 %v1194_v1  ;;  %v1106_v53 = vld [vmem:[#allocation2 + $0x150] ss:$8 sps:$4 sm:$0xff]   ;;  %v1115_v59 = vld [vmem:[#allocation2 + $0x180] ss:$8 sps:$4 sm:$0xff]   ;;  %v1120_v60 = vld [vmem:[#allocation2 + $0x194] ss:$8 sps:$4 sm:$0xff]  }
  0x20   :  { %v1112_v57 = vld [vmem:[#allocation2 + $0x170] ss:$8 sps:$4 sm:$0xff]   ;;  %v1123_v62 = vld [vmem:[#allocation2 + $0x1a4] ss:$8 sps:$4 sm:$0xff]   ;;  %v1121_v63 = vld [vmem:[#allocation2 + $0x1a0] ss:$8 sps:$4 sm:$0xff]  }
  0x21   :  { %1016 = vmatpush3.bf16.msra.mxu1 %v1081_v10  ;;  %v1118_v61 = vld [vmem:[#allocation2 + $0x190] ss:$8 sps:$4 sm:$0xff]   ;;  %v1126_v0 = vld [vmem:[#allocation2 + $0x1b4] ss:$8 sps:$4 sm:$0xff]   ;;  %v1129_v3 = vld [vmem:[#allocation2 + $0x1c4] ss:$8 sps:$4 sm:$0xff]  }
  0x22   :  { %1017 = vmatprep.subr.bf16.mxu1 %v1194_v1  ;;  %1034 = vmatpush3.bf16.msra.mxu0 %v1088_v17  ;;  %v1124_v2 = vld [vmem:[#allocation2 + $0x1b0] ss:$8 sps:$4 sm:$0xff]   ;;  %v1127_v4 = vld [vmem:[#allocation2 + $0x1c0] ss:$8 sps:$4 sm:$0xff]   ;;  %v1132_v5 = vld [vmem:[#allocation2 + $0x1d4] ss:$8 sps:$4 sm:$0xff]  }
  0x23   :  { %1035 = vmatprep.subr.bf16.mxu0 %v1194_v1  ;;  %v1130_v6 = vld [vmem:[#allocation2 + $0x1d0] ss:$8 sps:$4 sm:$0xff]   ;;  %v1135_v7 = vld [vmem:[#allocation2 + $0x1e4] ss:$8 sps:$4 sm:$0xff]   ;;  %v1133_v8 = vld [vmem:[#allocation2 + $0x1e0] ss:$8 sps:$4 sm:$0xff]  }
  0x24   :  { %v220_v9 = vld [vmem:[%s1302_s2 + $0x1] ss:$0 sm:$0xff]  ;;  %v1141_v21 = vld [vmem:[#allocation2 + $0x204] ss:$8 sps:$4 sm:$0xff]   ;;  %v1139_v24 = vld [vmem:[#allocation2 + $0x200] ss:$8 sps:$4 sm:$0xff]  }
  0x25   :  { %1018 = vmatpush3.bf16.msra.mxu1 %v1082_v11  ;;  %v1159_v22 = vld [vmem:[#allocation2 + $0x320] ss:$8 sps:$4 sm:$0xff]  }
  0x26   :  { %1019 = vmatprep.subr.bf16.mxu1 %v1194_v1  ;;  %1036 = vmatpush3.bf16.msra.mxu0 %v1089_v18 }
  0x27   :  { %1037 = vmatprep.subr.bf16.mxu0 %v1194_v1 }
  0x29   :  { %1020 = vmatpush3.bf16.msra.mxu1 %v1083_v12 }
  0x2a   :  { %1021 = vmatprep.subr.bf16.mxu1 %v1194_v1  ;;  %1038 = vmatpush3.bf16.msra.mxu0 %v1090_v19  ;;  %v1138_v19 = vld [vmem:[#allocation2 + $0x1f4] ss:$8 sps:$4 sm:$0xff]  }
  0x2b   :  { %1039 = vmatprep.subr.bf16.mxu0 %v1194_v1 }
  0x2d   :  { %1022 = vmatpush3.bf16.msra.mxu1 %v1084_v13 }
  0x2e   :  { %1023 = vmatprep.subr.bf16.mxu1 %v1194_v1  ;;  %1040 = vmatpush3.bf16.msra.mxu0 %v1091_v20  ;;  %v1136_v20 = vld [vmem:[#allocation2 + $0x1f0] ss:$8 sps:$4 sm:$0xff]  }
  0x2f   :  { %1041 = vmatprep.subr.bf16.mxu0 %v1194_v1 }
  0x31   :  { %1024 = vmatpush3.bf16.msra.mxu1 %v1085_v14 }
  0x32   :  { %1042 = vmatpush3.bf16.msra.mxu0 %v1092_v42  ;;  %580 = vmatprep.subr.bf16.mxu1 %v1096_v45 }
  0x33   :  { %1043 = vmatprep.subr.bf16.mxu0 %v1194_v1 }
  0x36   :  { %1044 = vmatpush3.bf16.msra.mxu0 %v1093_v43 }
  0xeb   :  { %v206_v28 = vpop.f32.mrb[0].mxu0 }
  0xec   :  { %v207_v29 = vadd.f32 %v206_v28, %v151_v26  ;;  %v208_v30 = vpop.f32.mrb[1].mxu0  ;;  %v1144_v28 = vld [vmem:[#allocation2 + $0x2a0] ss:$8 sps:$4 sm:$0xff]  }
  0xed   :  { %v209_v31 = vadd.f32 %v208_v30, %v155_v27  ;;  %v210_v32 = vpop.f32.mrb[2].mxu0  ;;  %v1146_v30 = vld [vmem:[#allocation2 + $0x2b0] ss:$8 sps:$4 sm:$0xff]  }
  0xee   :  { %v211_v33 = vadd.f32 %v210_v32, %v151_v26  ;;  %v212_v34 = vpop.f32.mrb[3].mxu0  ;;  %v215_v36 = vmax.f32 %v207_v29, 0.0  ;;  %v1142_v26 = vld [vmem:[#allocation2 + $0x290] ss:$8 sps:$4 sm:$0xff]   ;;  %v1145_v29 = vld [vmem:[#allocation2 + $0x220] ss:$8 sps:$4 sm:$0xff]  }
  0xef   :  { %v213_v35 = vadd.f32 %v212_v34, %v155_v27  ;;  %v216_v38 = vmax.f32 %v209_v31, 0.0  ;;  %v1143_v27 = vld [vmem:[#allocation2 + $0x210] ss:$8 sps:$4 sm:$0xff]   ;;  %978 = vmatprep.subr.bf16.mxu0 %v1142_v26  ;;  %v1148_v32 = vld [vmem:[#allocation2 + $0x2c0] ss:$8 sps:$4 sm:$0xff]  }
  0xf0   :  { %v217_v37 = vmax.f32 %v211_v33, 0.0  ;;  %v1147_v31 = vld [vmem:[#allocation2 + $0x230] ss:$8 sps:$4 sm:$0xff]   ;;  %v1149_v33 = vld [vmem:[#allocation2 + $0x240] ss:$8 sps:$4 sm:$0xff]  }
  0xf1   :  { %v218_v39 = vmax.f32 %v213_v35, 0.0  ;;  %v1150_v34 = vld [vmem:[#allocation2 + $0x2d0] ss:$8 sps:$4 sm:$0xff]  }
  0xf2   :  { %v1264_v40 = vpack.c.bf16 %v217_v37, %v215_v36  ;;  %v1151_v35 = vld [vmem:[#allocation2 + $0x250] ss:$8 sps:$4 sm:$0xff]   ;;  %v1152_v36 = vld [vmem:[#allocation2 + $0x2e0] ss:$8 sps:$4 sm:$0xff]  }
  0xf3   :  { %v219_v41 = vpack.c.bf16 %v218_v39, %v216_v38  ;;  %v313_v37 = vld [vmem:[%s1302_s2 + $0x2] ss:$0 sm:$0xff] }
  0xf5   :  { %1026 = vmatmul.mubr.bf16.vlgmr.msra.gmra.mrb[0].mxu1 %v219_v41 }
  0xf6   :  { %581 = vmatpush1.bf16.msra.mxu1 %v1094_v44 }
  0xf7   :  { %582 = vmatprep.subr.bf16.mxu1 %v1099_v46 }
  0xfa   :  { %583 = vmatpush1.bf16.msra.mxu1 %v1097_v47 }
  0xfb   :  { %584 = vmatprep.subr.bf16.mxu1 %v1102_v48  ;;  %v1153_v48 = vld [vmem:[#allocation2 + $0x260] ss:$8 sps:$4 sm:$0xff]  }
  0xfe   :  { %585 = vmatpush1.bf16.msra.mxu1 %v1100_v49  ;;  %v1154_v49 = vld [vmem:[#allocation2 + $0x2f0] ss:$8 sps:$4 sm:$0xff]  }
  0xff   :  { %586 = vmatprep.subr.bf16.mxu1 %v1105_v50  ;;  %v1155_v50 = vld [vmem:[#allocation2 + $0x270] ss:$8 sps:$4 sm:$0xff]  }
 0x102   :  { %587 = vmatpush1.bf16.msra.mxu1 %v1103_v51  ;;  %v1156_v51 = vld [vmem:[#allocation2 + $0x300] ss:$8 sps:$4 sm:$0xff]  }
 0x103   :  { %588 = vmatprep.subr.bf16.mxu1 %v1108_v52  ;;  %v1157_v52 = vld [vmem:[#allocation2 + $0x280] ss:$8 sps:$4 sm:$0xff]  }
 0x106   :  { %589 = vmatpush1.bf16.msra.mxu1 %v1106_v53  ;;  %v894_v53 = vld [vmem:[%s1302_s2 + $0x3] ss:$8 sm:$0x3] }
 0x107   :  { %590 = vmatprep.subr.bf16.mxu1 %v1111_v54  ;;  %v413_v54 = vrot.slane %v894_v53, %v150_v23  ;;  %v1160_v23 = vld [vmem:[#allocation2 + $0x330] ss:$8 sps:$4 sm:$0xff]  }
 0x10a   :  { %591 = vmatpush1.bf16.msra.mxu1 %v1109_v55 }
 0x10b   :  { %592 = vmatprep.subr.bf16.mxu1 %v1114_v56 }
 0x10e   :  { %593 = vmatpush1.bf16.msra.mxu1 %v1112_v57 }
 0x10f   :  { %594 = vmatprep.subr.bf16.mxu1 %v1117_v58 }
 0x112   :  { %595 = vmatpush1.bf16.msra.mxu1 %v1115_v59 }
 0x113   :  { %596 = vmatprep.subr.bf16.mxu1 %v1120_v60 }
 0x116   :  { %597 = vmatpush1.bf16.msra.mxu1 %v1118_v61 }
 0x117   :  { %598 = vmatprep.subr.bf16.mxu1 %v1123_v62 }
 0x11a   :  { %599 = vmatpush1.bf16.msra.mxu1 %v1121_v63 }
 0x11b   :  { %600 = vmatprep.subr.bf16.mxu1 %v1126_v0 }
 0x11e   :  { %601 = vmatpush1.bf16.msra.mxu1 %v1124_v2 }
 0x11f   :  { %602 = vmatprep.subr.bf16.mxu1 %v1129_v3 }
 0x122   :  { %603 = vmatpush1.bf16.msra.mxu1 %v1127_v4 }
 0x123   :  { %604 = vmatprep.subr.bf16.mxu1 %v1132_v5 }
 0x126   :  { %605 = vmatpush1.bf16.msra.mxu1 %v1130_v6  ;;  %v1158_v6 = vld [vmem:[#allocation2 + $0x310] ss:$8 sps:$4 sm:$0xff]  }
 0x127   :  { %606 = vmatprep.subr.bf16.mxu1 %v1135_v7  ;;  %v1162_v7 = vld [vmem:[#allocation2 + $0x350] ss:$8 sps:$4 sm:$0xff]  }
 0x12a   :  { %607 = vmatpush1.bf16.msra.mxu1 %v1133_v8  ;;  %v1163_v8 = vld [vmem:[#allocation2 + $0x360] ss:$8 sps:$4 sm:$0xff]  }
 0x12b   :  { %608 = vmatprep.subr.bf16.mxu1 %v1138_v19 }
 0x12e   :  { %609 = vmatpush1.bf16.msra.mxu1 %v1136_v20 }
 0x12f   :  { %610 = vmatprep.subr.bf16.mxu1 %v1141_v21 }
 0x132   :  { %611 = vmatpush1.bf16.msra.mxu1 %v1139_v24 }
 0x1c8   :  { %v303_v10 = vpop.f32.mrb[0].mxu1 }
 0x1c9   :  { %v304_v11 = vadd.f32 %v303_v10, %v220_v9  ;;  %v1027_v12 = vpop.f32.mrb[1].mxu1  ;;  %v1165_v10 = vld [vmem:[#allocation2 + $0x380] ss:$8 sps:$4 sm:$0xff]  }
 0x1ca   :  { %v306_v13 = vpop.f32.mrb[2].mxu1  ;;  %v629_v12 = vld [vmem:[%s1302_s2 + $0x4] ss:$0 sm:$0xff] }
 0x1cb   :  { %v307_v14 = vadd.f32 %v306_v13, %v220_v9  ;;  %v1028_v15 = vpop.f32.mrb[3].mxu1  ;;  %v310_v16 = vmax.f32 %v304_v11, 0.0  ;;  %v1164_v9 = vld [vmem:[#allocation2 + $0x370] ss:$8 sps:$4 sm:$0xff]  }
 0x1cd   :  { %v311_v17 = vmax.f32 %v307_v14, 0.0 }
 0x1cf   :  { %v312_v18 = vpack.c.bf16 %v311_v17, %v310_v16 }
 0x1d1   :  { %1046 = vmatmul.mubr.bf16.vlgmr.msra.gmra.mrb[4].mxu0 %v312_v18 }
 0x1d2   :  { %979 = vmatpush3.bf16.msra.mxu0 %v1143_v27 }
 0x1d3   :  { %980 = vmatprep.subr.bf16.mxu0 %v1144_v28 }
 0x1d6   :  { %981 = vmatpush3.bf16.msra.mxu0 %v1145_v29 }
 0x1d7   :  { %982 = vmatprep.subr.bf16.mxu0 %v1146_v30 }
 0x1da   :  { %983 = vmatpush3.bf16.msra.mxu0 %v1147_v31 }
 0x1db   :  { %984 = vmatprep.subr.bf16.mxu0 %v1148_v32 }
 0x1de   :  { %985 = vmatpush3.bf16.msra.mxu0 %v1149_v33 }
 0x1df   :  { %986 = vmatprep.subr.bf16.mxu0 %v1150_v34 }
 0x1e2   :  { %987 = vmatpush3.bf16.msra.mxu0 %v1151_v35 }
 0x1e3   :  { %988 = vmatprep.subr.bf16.mxu0 %v1152_v36 }
 0x1e6   :  { %989 = vmatpush3.bf16.msra.mxu0 %v1153_v48 }
 0x1e7   :  { %990 = vmatprep.subr.bf16.mxu0 %v1154_v49 }
 0x1ea   :  { %991 = vmatpush3.bf16.msra.mxu0 %v1155_v50 }
 0x1eb   :  { %992 = vmatprep.subr.bf16.mxu0 %v1156_v51 }
 0x1ee   :  { %993 = vmatpush3.bf16.msra.mxu0 %v1157_v52 }
 0x1ef   :  { %1049 = vmatprep.subr.bf16.mxu0 %v1194_v1 }
 0x2a4   :  { %v396_v38 = vpop.f32.mrb[4].mxu0 }
 0x2a5   :  { %v397_v39 = vadd.f32 %v396_v38, %v313_v37  ;;  %v1047_v41 = vpop.f32.mrb[5].mxu0 }
 0x2a6   :  { %v399_v42 = vpop.f32.mrb[6].mxu0 }
 0x2a7   :  { %v400_v43 = vadd.f32 %v399_v42, %v313_v37  ;;  %v1048_v44 = vpop.f32.mrb[7].mxu0  ;;  %v403_v45 = vmax.f32 %v397_v39, 0.0 }
 0x2a9   :  { %v404_v46 = vmax.f32 %v400_v43, 0.0 }
 0x2ab   :  { %v406_v47 = vpack.c.bf16 %v404_v46, %v403_v45 }
 0x2ad   :  { %612 = vmatprep.mubr.bf16.mxu1 %v406_v47 }
 0x2ae   :  { %613 = vmatmul.mubr.bf16.vlgmr.msra.gmra.mrb[4].mxu1 %v1264_v40  ;;  %v417_v40 = vrot.slane %v894_v53, %v154_v25  ;;  %v1161_v25 = vld [vmem:[#allocation2 + $0x340] ss:$8 sps:$4 sm:$0xff]  }
 0x381   :  { %v614_v55 = vpop.f32.mrb[4].mxu1 }
 0x382   :  { %v615_v56 = vadd.f32 %v614_v55, %v413_v54  ;;  %v616_v57 = vpop.f32.mrb[5].mxu1 }
 0x383   :  { %v617_v58 = vadd.f32 %v616_v57, %v417_v40  ;;  %v618_v59 = vpop.f32.mrb[6].mxu1 }
 0x384   :  { %v619_v60 = vadd.f32 %v618_v59, %v413_v54  ;;  %v620_v61 = vpop.f32.mrb[7].mxu1  ;;  %v623_v63 = vmax.f32 %v615_v56, 0.0 }
 0x385   :  { %v621_v62 = vadd.f32 %v620_v61, %v417_v40  ;;  %v624_v2 = vmax.f32 %v617_v58, 0.0 }
 0x386   :  { %v625_v0 = vmax.f32 %v619_v60, 0.0 }
 0x387   :  { %v626_v3 = vmax.f32 %v621_v62, 0.0 }
 0x388   :  { %v627_v4 = vpack.c.bf16 %v625_v0, %v623_v63 }
 0x389   :  { %v628_v5 = vpack.c.bf16 %v626_v3, %v624_v2 }
 0x38b   :  { %758 = vmatprep.mubr.bf16.mxu0 %v628_v5 }
 0x38c   :  { %759 = vmatmul.mubr.bf16.vlgmr.msra.gmra.mrb[8].mxu0 %v627_v4 }
 0x38d   :  { %1050 = vmatpush3.bf16.msra.mxu0 %v1158_v6  ;;  %1065 = vmatprep.mubr.msk.bf16.mxu0 %vm1195_vm1, %v1194_v1 }
 0x38e   :  { %1051 = vmatprep.subr.bf16.mxu0 %v1194_v1 }
 0x391   :  { %1052 = vmatpush3.bf16.msra.mxu0 %v1159_v22 }
 0x392   :  { %1053 = vmatprep.subr.bf16.mxu0 %v1194_v1 }
 0x395   :  { %1054 = vmatpush3.bf16.msra.mxu0 %v1160_v23 }
 0x396   :  { %1055 = vmatprep.subr.bf16.mxu0 %v1194_v1 }
 0x399   :  { %1056 = vmatpush3.bf16.msra.mxu0 %v1161_v25 }
 0x39a   :  { %1057 = vmatprep.subr.bf16.mxu0 %v1194_v1 }
 0x39d   :  { %1058 = vmatpush3.bf16.msra.mxu0 %v1162_v7 }
 0x39e   :  { %1059 = vmatprep.subr.bf16.mxu0 %v1194_v1 }
 0x3a1   :  { %1060 = vmatpush3.bf16.msra.mxu0 %v1163_v8 }
 0x3a2   :  { %1061 = vmatprep.subr.bf16.mxu0 %v1194_v1 }
 0x3a5   :  { %1062 = vmatpush3.bf16.msra.mxu0 %v1164_v9 }
 0x3a6   :  { %1063 = vmatprep.subr.bf16.mxu0 %v1194_v1  ;;  %v770_v1 = vld [vmem:[%s1302_s2 + $0x5] ss:$0 sm:$0xff] }
 0x3a9   :  { %1064 = vmatpush3.bf16.msra.mxu0 %v1165_v10 }
 0x45f   :  { %v994_v11 = vpop.f32.mrb[8].mxu0 }
 0x460   :  { %v995_v13 = vpop.f32.mrb[9].mxu0 }
 0x461   :  { %v996_v14 = vadd.f32 %v995_v13, %v994_v11  ;;  %v997_v15 = vpop.f32.mrb[10].mxu0 }
 0x462   :  { %v998_v16 = vpop.f32.mrb[11].mxu0 }
 0x463   :  { %v761_v17 = vadd.f32 %v996_v14, %v629_v12  ;;  %v999_v18 = vadd.f32 %v998_v16, %v997_v15 }
 0x465   :  { %v764_v19 = vadd.f32 %v999_v18, %v629_v12  ;;  %v767_v20 = vmax.f32 %v761_v17, 0.0 }
 0x467   :  { %v768_v21 = vmax.f32 %v764_v19, 0.0 }
 0x469   :  { %v769_v24 = vpack.c.bf16 %v768_v21, %v767_v20 }
 0x46b   :  { %1066 = vmatmul.mubr.bf16.vlgmr.msra.gmra.mrb[12].mxu0 %v769_v24 }
 0x53e   :  { %v853_v26 = vpop.f32.mrb[12].mxu0 }
 0x53f   :  { %v1067_v27 = vpop.f32.mrb[13].mxu0  ;;  %v854_v29 = vadd.f32 %v853_v26, %v770_v1 }
 0x540   :  { %v856_v28 = vpop.f32.mrb[14].mxu0 }
 0x541   :  { %v857_v30 = vadd.f32 %v856_v28, %v770_v1  ;;  %v1068_v31 = vpop.f32.mrb[15].mxu0 }
 0x543   :  { %v958_v32 = vpack.c.bf16 %v857_v30, %v854_v29 }
 0x545   :  { %959 = vst [vmem:[%s1303_s3] sm:$0xff] %v958_v32  }
 0x546   :  { %874 = vsyncpa [#allocation3], 1 }

</bundles_post_ra>
